<compile_context>
chip_gen: v5e
topology: v5e:2x2
jax: 0.10.0
libtpu: 0.0.40
codegen_flags: <defaults>
</compile_context>

<pallas_src>
import jax
import jax.numpy as jnp
from jax.experimental import pallas as pl
from jax.experimental.pallas import tpu as pltpu

LANES = 128
SUBLANES = 8
MAX_BLOCK_ROWS = 1024  # 1024 x 128 f32 = 512 KiB per buffer; safe on all generations.


def _uniform_noise_kernel(a_ref, x_ref, u_ref, o_ref):
    """y = x + (u - 0.5) * 2 * a, computed in f32, stored in the output dtype."""
    a = a_ref[0]
    x = x_ref[...].astype(jnp.float32)
    u = u_ref[...].astype(jnp.float32)
    noise = (u - jnp.float32(0.5)) * (jnp.float32(2.0) * a)
    o_ref[...] = (x + noise).astype(o_ref.dtype)


def _round_up(v, m):
    return ((v + m - 1) // m) * m


def uniform_noise(x, a=0.1, key=None):
    """Apply y = x + U(-a, a) elementwise via a tiled Pallas TPU kernel."""
    if key is None:
        key = jax.random.PRNGKey(0)

    orig_shape = x.shape
    orig_dtype = x.dtype
    n = x.size

    # Lane-dense 2D slab: (rows, 128), tiled along rows.
    rows = pl.cdiv(n, LANES)
    block_rows = min(MAX_BLOCK_ROWS, _round_up(rows, SUBLANES))
    padded_rows = _round_up(rows, block_rows)
    padded_n = padded_rows * LANES

    flat = x.reshape(-1)
    if padded_n != n:
        flat = jnp.pad(flat, (0, padded_n - n))
    x2d = flat.reshape(padded_rows, LANES)

    noise_dtype = orig_dtype if jnp.issubdtype(orig_dtype, jnp.floating) else jnp.float32
    # Generated directly at the padded 2D shape: no extra pad/copy pass for the noise.
    u2d = jax.random.uniform(key, (padded_rows, LANES), dtype=noise_dtype)

    a_arr = jnp.asarray([a], dtype=jnp.float32)

    grid = (padded_rows // block_rows,)
    out2d = pl.pallas_call(
        _uniform_noise_kernel,
        out_shape=jax.ShapeDtypeStruct((padded_rows, LANES), orig_dtype),
        grid=grid,
        in_specs=[
            pl.BlockSpec(memory_space=pltpu.MemorySpace.SMEM),      # a (scalar)
            pl.BlockSpec((block_rows, LANES), lambda i: (i, 0)),    # x tile
            pl.BlockSpec((block_rows, LANES), lambda i: (i, 0)),    # u tile
        ],
        out_specs=pl.BlockSpec((block_rows, LANES), lambda i: (i, 0)),
        compiler_params=pltpu.CompilerParams(
            dimension_semantics=("parallel",),
        ),
    )(a_arr, x2d, u2d)

    out = out2d.reshape(-1)
    if padded_n != n:
        out = out[:n]
    return out.reshape(orig_shape)


if __name__ == "__main__":
    # UniformNoise(a=0.1) applied to an NCHW tensor (like torch.rand(2, 4, 16, 16)).
    a = 0.1
    key = jax.random.PRNGKey(0)
    kx, knoise = jax.random.split(key)
    x = jax.random.uniform(kx, (2, 4, 16, 16), dtype=jnp.float32)

    y = uniform_noise(x, a=a, key=knoise)
    y = jax.block_until_ready(y)

    assert y.shape == x.shape, (y.shape, x.shape)
    assert y.dtype == x.dtype, (y.dtype, x.dtype)
    assert bool(jnp.all(jnp.isfinite(y)))

    eps = y - x
    # Noise must be bounded by the amplitude a, non-degenerate, and ~zero-mean.
    assert float(jnp.max(jnp.abs(eps))) <= a + 1e-5
    assert float(jnp.max(jnp.abs(eps))) > 0.0
    assert abs(float(jnp.mean(eps))) < 0.05

    print("KERNEL_OK")
</pallas_src>

<mosaic_0001>
module attributes {stable_mosaic.version = 11 : i64} {
  func.func @_uniform_noise_kernel(%arg0: i32, %arg1: memref<1xf32, #tpu.memory_space<smem>>, %arg2: memref<16x128xf32, #tpu.memory_space<vmem>>, %arg3: memref<16x128xf32, #tpu.memory_space<vmem>>, %arg4: memref<16x128xf32, #tpu.memory_space<vmem>>) attributes {dimension_semantics = [#tpu.dimension_semantics<parallel>], iteration_bounds = array<i64: 1>, scalar_prefetch = 0 : i64, scratch_operands = 0 : i64, tpu.core_type = #tpu.core_type<tc>, window_params = [{transform_indices = @transform_0, window_bounds = array<i64: 1>}, {transform_indices = @transform_1, window_bounds = array<i64: 16, 128>}, {transform_indices = @transform_2, window_bounds = array<i64: 16, 128>}, {transform_indices = @transform_3, window_bounds = array<i64: 16, 128>}]} {
    %c0 = arith.constant 0 : index
    %0 = memref.load %arg1[%c0] : memref<1xf32, #tpu.memory_space<smem>>
    %c0_0 = arith.constant 0 : index
    %c0_1 = arith.constant 0 : index
    %1 = vector.load %arg2[%c0_0, %c0_1] : memref<16x128xf32, #tpu.memory_space<vmem>>, vector<16x128xf32>
    %c0_2 = arith.constant 0 : index
    %c0_3 = arith.constant 0 : index
    %2 = vector.load %arg3[%c0_2, %c0_3] : memref<16x128xf32, #tpu.memory_space<vmem>>, vector<16x128xf32>
    %cst = arith.constant 5.000000e-01 : f32
    %3 = vector.broadcast %cst : f32 to vector<16x128xf32>
    %4 = arith.subf %2, %3 : vector<16x128xf32>
    %cst_4 = arith.constant 2.000000e+00 : f32
    %5 = arith.mulf %cst_4, %0 : f32
    %6 = vector.broadcast %5 : f32 to vector<16x128xf32>
    %7 = arith.mulf %4, %6 : vector<16x128xf32>
    %8 = arith.addf %1, %7 : vector<16x128xf32>
    %c0_5 = arith.constant 0 : index
    %c0_6 = arith.constant 0 : index
    %9 = vector.load %arg4[%c0_5, %c0_6] : memref<16x128xf32, #tpu.memory_space<vmem>>, vector<16x128xf32>
    tpu.vector_store %arg4[%c0_5, %c0_6], %8 {strides = array<i32>} : memref<16x128xf32, #tpu.memory_space<vmem>>, vector<16x128xf32>,
    return
  }
  func.func @transform_0(%arg0: i32) -> i32 {
    %c0_i32 = arith.constant 0 : i32
    %c0_i32_0 = arith.constant 0 : i32
    return %c0_i32 : i32
  }
  func.func @transform_1(%arg0: i32) -> (i32, i32) {
    %c0_i32 = arith.constant 0 : i32
    %c0_i32_0 = arith.constant 0 : i32
    return %arg0, %c0_i32 : i32, i32
  }
  func.func @transform_2(%arg0: i32) -> (i32, i32) {
    %c0_i32 = arith.constant 0 : i32
    %c0_i32_0 = arith.constant 0 : i32
    return %arg0, %c0_i32 : i32, i32
  }
  func.func @transform_3(%arg0: i32) -> (i32, i32) {
    %c0_i32 = arith.constant 0 : i32
    %c0_i32_0 = arith.constant 0 : i32
    return %arg0, %c0_i32 : i32, i32
  }
}

</mosaic_0001>

<bundles_post_ra>
// kernel: tpu_custom_call.1
= control target key start
LH: loop header
LB: loop body
LE: loop exit
PB: predicated region body
PF: predicated region fallthrough
CT: control target
= control target key end

     0   :  { %9 = vsyncpa [#allocation4], 0  ;;  %s214_s0 = inlined_call_operand.<no memory space> [shape: f32[1], index: 0, kind: input, shape index: {}]   ;;  %s215_s1 = inlined_call_operand.hbm [shape: f32[16,128], index: 1, kind: input, shape index: {}]   ;;  %s216_s2 = inlined_call_operand.hbm [shape: f32[16,128], index: 2, kind: input, shape index: {}]   ;;  %s217_s3 = inlined_call_operand.hbm [shape: f32[16,128], index: 3, kind: output, shape index: {}]  }
   0x1   :  { %10 = vsyncpa [#allocation7], 0 }
   0x2   :  { %11 = vsyncpa [#allocation5], 0  ;;  %s18_s14 = sshll.u32 %s215_s1, 4  ;;  %s168_s15 = smov [#allocation3]   ;;  %s19_s14 = int_to_ptr.hbm [resolvable:$true] %s18_s14 }
   0x3   :  { %s20_s16 = sshll.u32 %s168_s15, 4  ;;  %s31_s19 = sshll.u32 %s216_s2, 4  ;;  %s21_s16 = int_to_ptr.vmem [resolvable:$true] %s20_s16  ;;  %s32_s19 = int_to_ptr.hbm [resolvable:$true] %s31_s19 }
   0x4   :  { %s169_s20 = smov 128   ;;  %s170_s21 = smov 8  }
   0x5   :  { %26 = dma.hbm_to_vmem [thread:$0]  %s19_s14, 256, %s21_s16, [#allocation4], %s169_s20, %s169_s20, %s170_s21  }
   0x6   :  { %s171_s22 = smov [#allocation6]  }
   0x7   :  { %s33_s23 = sshll.u32 %s171_s22, 4  ;;  %s34_s23 = int_to_ptr.vmem [resolvable:$true] %s33_s23 }
   0x8   :  { %39 = dma.hbm_to_vmem [thread:$0]  %s32_s19, 256, %s34_s23, [#allocation7], %s169_s20, %s169_s20, %s170_s21  }
   0x9   :  { %162 = dma.done.wait [#allocation4], 256  }
   0xa   :  { %163 = vsyncadd [#allocation4], 4294967040 }
   0xb   :  { %164 = dma.done.wait [#allocation7], 256  }
   0xc   :  { %165 = vsyncadd [#allocation7], 4294967040  ;;  %s55_s24 = smul.f32 2.0, %s214_s0  ;;  %v51_v0 = vld [vmem:[#allocation6] sm:$0xff]  ;;  %v52_v3 = vld [vmem:[#allocation6 + $0x8] sm:$0xff]  ;;  %s172_s25 = smov [#allocation8]  }
   0xd   :  { %v83_v2 = vadd.f32 -0.5, %v51_v0  ;;  %v49_v4 = vld [vmem:[#allocation3] sm:$0xff]  ;;  %v84_v5 = vadd.f32 -0.5, %v52_v3  ;;  %v50_v7 = vld [vmem:[#allocation3 + $0x8] sm:$0xff]  ;;  %s67_s26 = sshll.u32 %s172_s25, 4  ;;  %s69_s29 = sshll.u32 %s217_s3, 4  ;;  %s68_s26 = int_to_ptr.vmem [resolvable:$true] %s67_s26  ;;  %s70_s29 = int_to_ptr.hbm [resolvable:$true] %s69_s29 }
   0xe   :  { %v56_v1 = vstv %s55_s24 }
   0xf   :  { %v57_v6 = vmul.f32 %v83_v2, %v56_v1  ;;  %v58_v8 = vmul.f32 %v84_v5, %v56_v1 }
  0x11   :  { %v59_v9 = vadd.f32 %v57_v6, %v49_v4  ;;  %v60_v10 = vadd.f32 %v58_v8, %v50_v7 }
  0x13   :  { %61 = vst [vmem:[#allocation8] sm:$0xff] %v59_v9 }
  0x14   :  { %62 = vst [vmem:[#allocation8 + $0x8] sm:$0xff] %v60_v10 }
  0x15   :  { %75 = dma.vmem_to_hbm [thread:$0]  %s68_s26, 256, %s70_s29, [#allocation5], %s169_s20, %s169_s20, %s170_s21  }
  0x16   :  { %166 = dma.done.wait [#allocation5], 256  }
  0x17   :  { %167 = vsyncadd [#allocation5], 4294967040 }
  0x18   :  { %80 = vsyncpa [#allocation4], 1 }
  0x19   :  { %81 = vsyncpa [#allocation7], 1 }
  0x1a   :  { %82 = vsyncpa [#allocation5], 1 }

</bundles_post_ra>
